<compile_context>
chip_gen: v7x
topology: tpu7x:2x2x1
jax: 0.10.0
libtpu: 0.0.40
codegen_flags: <defaults>
</compile_context>

<pallas_src>
import functools

import jax
import jax.numpy as jnp
from jax.experimental import pallas as pl
from jax.experimental.pallas import tpu as pltpu


def _round_up(x, m):
    return ((x + m - 1) // m) * m


def _layernorm_kernel(alpha_ref, gamma_ref, x_ref, o_ref, *, epsilon, n):
    # x_ref block: (tile_rows, H) in VMEM; alpha/gamma: (1,) scalars in SMEM.
    x = x_ref[...].astype(jnp.float32)

    # Mean over the true last dim (block last dim == full H, so no masking).
    mean = jnp.sum(x, axis=-1, keepdims=True) * (1.0 / n)
    diff = x - mean

    # torch.std defaults to the unbiased estimator (divide by N-1).
    var = jnp.sum(diff * diff, axis=-1, keepdims=True) * (1.0 / (n - 1))
    std = jnp.sqrt(var)

    # Exact per-row reciprocal; fold alpha into the per-row scale so the
    # whole-tile work is one multiply + one add.
    inv = pl.reciprocal(std + epsilon, approx=False)          # (tile_rows, 1)
    scale = alpha_ref[0] * inv
    o_ref[...] = (diff * scale + gamma_ref[0]).astype(o_ref.dtype)


def layer_norm_pallas(x, alpha, gamma, epsilon=1e-6, tile_rows=None):
    """LayerNorm over the last axis of x using a Pallas TPU kernel."""
    orig_shape = x.shape
    H = orig_shape[-1]
    if H < 2:
        # torch.std (unbiased) on a single element is NaN; refuse explicitly.
        raise ValueError("LayerNorm requires the last dim >= 2 (unbiased std).")

    x2 = x.reshape(-1, H)
    R = x2.shape[0]
    itemsize = jnp.dtype(x.dtype).itemsize

    if tile_rows is None:
        # Mem-bound kernel: size the tile by the f32 intermediate footprint
        # (~4 MiB per tile) so per-step overhead (~0.35 us) is amortized even
        # on v7x's 3.2 TB/s HBM, while double-buffered in/out tiles plus f32
        # temps stay under the scoped-VMEM budget on every generation.
        target_tile_bytes_f32 = 4 << 20
        tile_rows = max(8, target_tile_bytes_f32 // (H * 4))
    tile_rows = max(8, (int(tile_rows) // 8) * 8)           # sublane-aligned

    # Keep at least ~8 grid steps when R allows it, so the "parallel" axis can
    # shard across v7x's two TensorCores and each core keeps its pipeline full.
    min_steps = 8
    max_tile_for_steps = max(8, _round_up(pl.cdiv(R, min_steps), 8))
    tile_rows = min(tile_rows, max_tile_for_steps)
    tile_rows = min(tile_rows, _round_up(R, 8))

    grid = (pl.cdiv(R, tile_rows),)
    kernel = functools.partial(_layernorm_kernel, epsilon=epsilon, n=H)

    cost = pl.CostEstimate(
        flops=7 * R * H,
        transcendentals=2 * R,                    # sqrt + reciprocal per row
        bytes_accessed=2 * R * H * itemsize,      # one read + one write pass
    )

    out = pl.pallas_call(
        kernel,
        out_shape=jax.ShapeDtypeStruct((R, H), x.dtype),
        grid=grid,
        in_specs=[
            pl.BlockSpec(memory_space=pltpu.MemorySpace.SMEM),   # alpha (1,)
            pl.BlockSpec(memory_space=pltpu.MemorySpace.SMEM),   # gamma (1,)
            pl.BlockSpec((tile_rows, H), lambda i: (i, 0)),      # x row tile
        ],
        out_specs=pl.BlockSpec((tile_rows, H), lambda i: (i, 0)),
        compiler_params=pltpu.CompilerParams(
            dimension_semantics=("parallel",),    # megacore-shardable on v7x
            vmem_limit_bytes=40 << 20,            # safe on v5e/v6e/v7x (64MiB/TC)
        ),
        cost_estimate=cost,
    )(alpha, gamma, x2)

    return out.reshape(orig_shape)


def layer_norm_ref(x, alpha, gamma, epsilon=1e-6):
    """Pure-JAX reference matching the PyTorch forward exactly."""
    xf = x.astype(jnp.float32)
    mean = jnp.mean(xf, axis=-1, keepdims=True)
    n = x.shape[-1]
    var = jnp.sum((xf - mean) ** 2, axis=-1, keepdims=True) / (n - 1)
    std = jnp.sqrt(var)
    return (alpha[0] * (xf - mean) / (std + epsilon) + gamma[0]).astype(x.dtype)


if __name__ == "__main__":
    key = jax.random.PRNGKey(0)

    # Small shapes implied by the forward: (batch, seq, hidden)
    batch, seq, hidden = 2, 8, 32
    x = jax.random.normal(key, (batch, seq, hidden), dtype=jnp.float32)

    # Deterministic parameter init per nn.Module.__init__:
    alpha = jnp.ones((1,), dtype=jnp.float32)   # torch.ones(1)
    gamma = jnp.zeros((1,), dtype=jnp.float32)  # torch.zeros(1)

    out = layer_norm_pallas(x, alpha, gamma, epsilon=1e-6)
    out = jax.block_until_ready(out)

    ref = layer_norm_ref(x, alpha, gamma, epsilon=1e-6)
    assert out.shape == x.shape
    # Exact reciprocal now; only f32 accumulation-order differences remain.
    assert jnp.allclose(out, ref, atol=1e-5, rtol=1e-5), "mismatch vs reference"

    print("KERNEL_OK")
</pallas_src>

<mosaic_0001>
module attributes {stable_mosaic.version = 11 : i64} {
  func.func @_layernorm_kernel(%arg0: i32, %arg1: memref<1xf32, #tpu.memory_space<smem>>, %arg2: memref<1xf32, #tpu.memory_space<smem>>, %arg3: memref<8x32xf32, #tpu.memory_space<vmem>>, %arg4: memref<8x32xf32, #tpu.memory_space<vmem>>) attributes {dimension_semantics = [#tpu.dimension_semantics<parallel>], iteration_bounds = array<i64: 2>, scalar_prefetch = 0 : i64, scratch_operands = 0 : i64, tpu.core_type = #tpu.core_type<tc>, window_params = [{transform_indices = @transform_0, window_bounds = array<i64: 1>}, {transform_indices = @transform_1, window_bounds = array<i64: 1>}, {transform_indices = @transform_2, window_bounds = array<i64: 8, 32>}, {transform_indices = @transform_3, window_bounds = array<i64: 8, 32>}]} {
    %c0 = arith.constant 0 : index
    %c0_0 = arith.constant 0 : index
    %0 = vector.load %arg3[%c0, %c0_0] : memref<8x32xf32, #tpu.memory_space<vmem>>, vector<8x32xf32>
    %cst = arith.constant dense<0.000000e+00> : vector<8xf32>
    %1 = vector.multi_reduction <add>, %0, %cst [1] : vector<8x32xf32> to vector<8xf32>
    %2 = vector.shape_cast %1 : vector<8xf32> to vector<8x1xf32>
    %cst_1 = arith.constant 3.125000e-02 : f32
    %3 = vector.broadcast %cst_1 : f32 to vector<8x1xf32>
    %4 = arith.mulf %2, %3 : vector<8x1xf32>
    %5 = vector.broadcast %4 : vector<8x1xf32> to vector<8x32xf32>
    %6 = arith.subf %0, %5 : vector<8x32xf32>
    %7 = arith.mulf %6, %6 : vector<8x32xf32>
    %cst_2 = arith.constant dense<0.000000e+00> : vector<8xf32>
    %8 = vector.multi_reduction <add>, %7, %cst_2 [1] : vector<8x32xf32> to vector<8xf32>
    %9 = vector.shape_cast %8 : vector<8xf32> to vector<8x1xf32>
    %cst_3 = arith.constant 0.0322580636 : f32
    %10 = vector.broadcast %cst_3 : f32 to vector<8x1xf32>
    %11 = arith.mulf %9, %10 : vector<8x1xf32>
    %12 = math.sqrt %11 : vector<8x1xf32>
    %cst_4 = arith.constant 9.99999997E-7 : f32
    %13 = vector.broadcast %cst_4 : f32 to vector<8x1xf32>
    %14 = arith.addf %12, %13 : vector<8x1xf32>
    %15 = tpu.reciprocal %14 : vector<8x1xf32> -> vector<8x1xf32>
    %c0_5 = arith.constant 0 : index
    %16 = memref.load %arg1[%c0_5] : memref<1xf32, #tpu.memory_space<smem>>
    %17 = vector.broadcast %16 : f32 to vector<8x1xf32>
    %18 = arith.mulf %17, %15 : vector<8x1xf32>
    %19 = vector.broadcast %18 : vector<8x1xf32> to vector<8x32xf32>
    %20 = arith.mulf %6, %19 : vector<8x32xf32>
    %c0_6 = arith.constant 0 : index
    %21 = memref.load %arg2[%c0_6] : memref<1xf32, #tpu.memory_space<smem>>
    %22 = vector.broadcast %21 : f32 to vector<8x32xf32>
    %23 = arith.addf %20, %22 : vector<8x32xf32>
    %c0_7 = arith.constant 0 : index
    %c0_8 = arith.constant 0 : index
    %24 = vector.load %arg4[%c0_7, %c0_8] : memref<8x32xf32, #tpu.memory_space<vmem>>, vector<8x32xf32>
    tpu.vector_store %arg4[%c0_7, %c0_8], %23 {strides = array<i32>} : memref<8x32xf32, #tpu.memory_space<vmem>>, vector<8x32xf32>,
    return
  }
  func.func @transform_0(%arg0: i32) -> i32 {
    %c0_i32 = arith.constant 0 : i32
    %c0_i32_0 = arith.constant 0 : i32
    return %c0_i32 : i32
  }
  func.func @transform_1(%arg0: i32) -> i32 {
    %c0_i32 = arith.constant 0 : i32
    %c0_i32_0 = arith.constant 0 : i32
    return %c0_i32 : i32
  }
  func.func @transform_2(%arg0: i32) -> (i32, i32) {
    %c0_i32 = arith.constant 0 : i32
    %c0_i32_0 = arith.constant 0 : i32
    return %arg0, %c0_i32 : i32, i32
  }
  func.func @transform_3(%arg0: i32) -> (i32, i32) {
    %c0_i32 = arith.constant 0 : i32
    %c0_i32_0 = arith.constant 0 : i32
    return %arg0, %c0_i32 : i32, i32
  }
}

</mosaic_0001>

<bundles_post_ra>
// kernel: tpu_custom_call.1
= control target key start
LH: loop header
LB: loop body
LE: loop exit
PB: predicated region body
PF: predicated region fallthrough
CT: control target
= control target key end

     0   :  { %s657_s0 = inlined_call_operand.<no memory space> [shape: f32[1], index: 0, kind: input, shape index: {}]   ;;  %s658_s1 = inlined_call_operand.<no memory space> [shape: f32[1], index: 1, kind: input, shape index: {}]   ;;  %s659_s2 = inlined_call_operand.hbm [shape: f32[16,32], index: 2, kind: input, shape index: {}]   ;;  %s660_s3 = inlined_call_operand.hbm [shape: f32[16,32], index: 3, kind: output, shape index: {}]  }
   0x1   :  { %8 = sst [smem:[#allocation2]] %s657_s0 }
   0x2   :  { %9 = sst [smem:[#allocation3]] %s658_s1 }
   0x3   :  { %10 = vsyncpa [#allocation5], 0 }
   0x4   :  { %12 = vsyncpa [#allocation5 + $0x1], 0 }
   0x5   :  { %13 = vsyncpa [#allocation6], 0 }
   0x6   :  { %15 = vsyncpa [#allocation6 + $0x1], 0  ;;  %s489_s16 = smov 0   ;;  %s491_s17 = smov 0  }
   0x7   :  { %s493_s18 = smov 0   ;;  %s495_s19 = smov 0  }
   0x8 LB: > { %s510_s0 = sadd.s32 4294967295, %s459_s19   ;;  %s301_s1 = sadd.s32 4294967294, %s459_s19   ;;  %s459_s19 = sphi %s495_s19, %s675_s19   ;;  %s455_s18 = sphi %s493_s18, %s674_s18   ;;  %s451_s17 = sphi %s491_s17, %s673_s17   ;;  %s447_s16 = sphi %s489_s16, %s672_s16  }
   0x9   : > { %s514_s20 = sadd.s32 1, %s459_s19   ;;  %s70_s21 = sadd.s32 1, %s455_s18 }
   0xa   : > { %s67_s22 = ssub.s32 %s459_s19, %s514_s20  ;;  %p77_p0 = scmp.ne.s32.totalorder %s455_s18, %s451_s17 }
   0xb   : > { %p68_p1 = scmp.eq.s32.totalorder %s67_s22, 0  ;;  %p78_p2 = scmp.eq.s32.totalorder %s459_s19, 0 }
   0xc   : > { %p83_p3 = scmp.ne.s32.totalorder %s451_s17, %s447_s16  ;;  %p84_p4 = scmp.eq.s32.totalorder %s510_s0, 0 }
   0xd   : > { %s526_s23 = scalar_select %p68_p1, %s455_s18, %s70_s21  }
   0xe   : > { %p528_p5 = por %p78_p2, %p77_p0  ;;  %p532_p6 = por %p84_p4, %p83_p3 }
   0xf   : > { %p107_p7 = scmp.eq.s32.totalorder %s510_s0, 1  ;;  %p113_p8 = scmp.eq.s32.totalorder %s301_s1, 1 }
  0x10   : > { %p325_p10 = scmp.lt.s32.totalorder %s459_s19, 2  ;;  %s139_s28 = sand.u32 1, %s455_s18  }
  0x11   : > { %p539_p11 = por %p107_p7, %p77_p0  ;;  %p543_p12 = por %p113_p8, %p83_p3 }
  0x12   : > { %s305_s29 = sshll.u32 %s459_s19, 7  ;;  %s304_s30 = sshll.u32 %s139_s28, 3 }
  0x13   : > { %s664_s26 = scalar_select %p539_p11, 1, 0 }
  0x14   : > { %s665_s27 = scalar_select %p543_p12, 1, 0 }
  0x15   : > { %s552_s6 = scalar_lea.hbm %s659_s2, %s305_s29  ;;  %s143_s7 = scalar_lea.vmem [#allocation4], %s304_s30 }
  0x16   : > { %s150_s8 = sshll.u32 %s143_s7, 4  ;;  %p556_p13 = pnand %p325_p10, %p528_p5  ;;  %s560_s8 = int_to_ptr.vmem [resolvable:$true] %s150_s8 }
  0x17   : > { %s140_s10 = scalar_lea.sflag [#allocation5], %s139_s28  ;;  %s363_s11 = scalar_lea.hbm %s552_s6, 128 }
  0x18   : > { %p364_p2 = scmp.ne.s32.totalorder %s552_s6, %s363_s11  ;;  %p365_p3 = pneg %p556_p13 }
  0x19   : > { %s368_s14 = scalar_lea.hbm %s659_s2, 256  ;;  %p369_p5 = scmp.lt.u32.totalorder %s552_s6, %s659_s2 }
  0x1a   : > { %p366_p4 = pnand %p365_p3, %p364_p2  ;;  %p370_p8 = scmp.lt.u32.totalorder %s368_s14, %s363_s11 }
  0x1b   : > { %p372_p9 = scmp.lt.u32.totalorder %s363_s11, %s552_s6 }
  0x1c   : > { %p367_p7 = pneg %p366_p4  ;;  %p371_p10 = por %p370_p8, %p369_p5 }
  0x1e   : > { %p373_p0 = por %p372_p9, %p371_p10 }
  0x20   : > { %p374_p1 = pnand %p373_p0, %p367_p7 }
  0x22   : > { %377 = shalt.err (!%p374_p1)
}
  0x23   : > { %s378_s21 = scalar_lea.vmem %s560_s8, 128  ;;  %s461_s22 = smov [#allocation4]  }
  0x24   : > { %p379_p2 = scmp.ne.s32.totalorder %s560_s8, %s378_s21  ;;  %s383_s24 = sshll.u32 %s461_s22, 4  ;;  %s384_s24 = int_to_ptr.vmem [resolvable:$false] %s383_s24 }
  0x25   : > { %s385_s28 = scalar_lea.vmem %s384_s24, 256  ;;  %p386_p11 = scmp.lt.s32.totalorder %s560_s8, %s384_s24 }
  0x26   : > { %p381_p4 = pnand %p379_p2, %p365_p3  ;;  %p387_p5 = scmp.lt.s32.totalorder %s385_s28, %s378_s21 }
  0x28   : > { %p382_p12 = pneg %p381_p4  ;;  %p388_p8 = por %p387_p5, %p386_p11 }
  0x2a   : > { %p389_p9 = pnand %p388_p8, %p382_p12 }
  0x2c   : > { %392 = shalt.err (!%p389_p9)
}
  0x2d   : > { %320 = dma.hbm_to_vmem [thread:$0]  (!%p556_p13), %s552_s6, 128, %s560_s8, %s140_s10  }
  0x2e   : > { %p667_p0 = scmp.lt.s32.totalorder %s459_s19, 3  ;;  %p668_p1 = scmp.ge.s32.totalorder %s459_s19, 1 }
  0x30   : > { %p156_p3 = pnand %p668_p1, %p667_p0 }
  0x31   : > { %s594_s29 = sand.u32 (!%p156_p3), 1, %s451_s17  }
  0x32   : > { %159 = sbr.rel (%p156_p3) target bundleno = 401 (0x191), region = 32  ;;  %s307_s30 = sshll.u32 (!%p156_p3), %s594_s29, 3 }
  0x33   : > { %s162_s4 = scalar_lea.sflag (!%p156_p3), [#allocation5], %s594_s29  ;;  %s165_s5 = scalar_lea.vmem (!%p156_p3), [#allocation4], %s307_s30 }
  0x39   : > { %438 = dma.done.wait (%p532_p6), %s162_s4, 128  }
  0x3a   : > { %440 = vsyncadd (%p532_p6), %s162_s4, 4294967168  ;;  %vm189_vm0 = vcmask 261120   ;;  %v188_v0 = vld [vmem:[%s165_s5] sm:$0xff]  ;;  %s209_s25 = sld [smem:[#allocation2]]  ;;  %s310_s7 = sshll.u32 %s510_s0, 7 }
  0x3b   : > { %v190_v1 = vsel %vm189_vm0, %v188_v0, 0.0  ;;  %s213_s6 = sld [smem:[#allocation3]]  ;;  %s187_s8 = scalar_lea.vmem [#allocation7], %s307_s30 }
  0x3c   : > { %191 = vadd.xlane.f32.xlu0 %v190_v1  ;;  %s231_s9 = sshll.u32 %s187_s8, 4  ;;  %s612_s12 = scalar_lea.hbm %s660_s3, %s310_s7  ;;  %s614_s9 = int_to_ptr.vmem [resolvable:$true] %s231_s9 }
  0x3d   : > { %s218_s13 = scalar_lea.sflag [#allocation6], %s594_s29  ;;  %s393_s14 = scalar_lea.vmem %s614_s9, 128 }
  0x3e   : > { %p394_p6 = scmp.ne.s32.totalorder %s614_s9, %s393_s14  ;;  %p669_p11 = scmp.ne.s32.totalorder %s664_s26, 0 }
  0x3f   : > { %s462_s0 = smov [#allocation7]  }
  0x40   : > { %v210_v15 = vstv %s209_s25  ;;  %p395_p12 = pnand %p394_p6, %p669_p11  ;;  %s397_s15 = sshll.u32 %s462_s0, 4  ;;  %s398_s15 = int_to_ptr.vmem [resolvable:$false] %s397_s15 }
  0x41   : > { %v214_v18 = vstv %s213_s6  ;;  %s399_s1 = scalar_lea.vmem %s398_s15, 256  ;;  %p400_p7 = scmp.lt.s32.totalorder %s614_s9, %s398_s15 }
  0x42   : > { %p396_p13 = pneg %p395_p12  ;;  %p401_p10 = scmp.lt.s32.totalorder %s399_s1, %s393_s14 }
  0x44   : > { %p402_p2 = por %p401_p10, %p400_p7 }
  0x46   : > { %p403_p4 = pnand %p402_p2, %p396_p13 }
  0xc9   : > { %v192_v2 = vpop.xlane.xlu0 %191 }
  0xca   : > { %v193_v3 = vmul.f32 0.03125, %v192_v2 }
  0xcc   : > { %v194_v4 = vsub.f32 %v188_v0, %v193_v3 }
  0xce   : > { %v195_v5 = vmul.f32 %v194_v4, %v194_v4 }
  0xd0   : > { %v196_v6 = vsel %vm189_vm0, %v195_v5, 0.0 }
  0xd1   : > { %197 = vadd.xlane.f32.xlu0 %v196_v6 }
 0x15e   : > { %v198_v7 = vpop.xlane.xlu0 %197 }
 0x15f   : > { %v199_v8 = vmul.f32 0.032258064, %v198_v7 }
 0x161   : > { %359 = vrsqrt.f32 %v199_v8  ;;  %vm202_vm1 = vcmp.eq.f32.partialorder %v199_v8, inf  ;;  %v205_v11 = vand.u32 2147483648, %v199_v8  ;;  %vm204_vm2 = vcmp.eq.f32.partialorder %v199_v8, 0.0 }
 0x16b   : > { %v360_v9 = vpop.eup %359 }
 0x16c   : > { %v201_v10 = vmul.f32 %v360_v9, %v199_v8 }
 0x16e   : > { %v203_v12 = vsel %vm202_vm1, %v199_v8, %v201_v10 }
 0x16f   : > { %v206_v13 = vsel %vm204_vm2, %v205_v11, %v203_v12 }
 0x170   : > { %v207_v14 = vadd.f32 1e-06, %v206_v13 }
 0x172   : > { %361 = vrcp.f32 %v207_v14 }
 0x17c   : > { %v362_v16 = vpop.eup %361 }
 0x17d   : > { %v211_v17 = vmul.f32 %v362_v16, %v210_v15 }
 0x17f   : > { %v212_v19 = vmul.f32 %v211_v17, %v194_v4 }
 0x181   : > { %v215_v20 = vadd.f32 %v214_v18, %v212_v19 }
 0x183   : > { %216 = vst.msk [vmem:[%s187_s8] sm:$0xff] %vm189_vm0, %v215_v20 }
 0x184   : > { %406 = shalt.err (!%p403_p4)
}
 0x185   : > { %s407_s21 = scalar_lea.hbm %s612_s12, 128  ;;  %s411_s28 = scalar_lea.hbm %s660_s3, 256 }
 0x186   : > { %p408_p5 = scmp.ne.s32.totalorder %s612_s12, %s407_s21  ;;  %p412_p0 = scmp.lt.u32.totalorder %s612_s12, %s660_s3 }
 0x187   : > { %p413_p1 = scmp.lt.u32.totalorder %s411_s28, %s407_s21  ;;  %p415_p6 = scmp.lt.u32.totalorder %s407_s21, %s612_s12 }
 0x188   : > { %p409_p8 = pnand %p408_p5, %p669_p11 }
 0x189   : > { %p414_p3 = por %p413_p1, %p412_p0 }
 0x18a   : > { %p410_p9 = pneg %p409_p8 }
 0x18b   : > { %p416_p12 = por %p415_p6, %p414_p3 }
 0x18d   : > { %p417_p13 = pnand %p416_p12, %p410_p9 }
 0x18f   : > { %420 = shalt.err (!%p417_p13)
}
 0x190   : > { %315 = dma.vmem_to_hbm [thread:$0]  (%p669_p11), %s614_s9, 128, %s612_s12, %s218_s13  }
 0x191 PF: > { %s243_s4 = sand.u32 1, %s447_s16   ;;  %p670_p7 = scmp.ne.s32.totalorder %s665_s27, 0 }
 0x192   : > { %p671_p10 = scmp.ge.s32.totalorder %s459_s19, 2  ;;  %s244_s5 = scalar_lea.sflag [#allocation6], %s243_s4 }
 0x194   : > { %p322_p2 = pnand %p671_p10, %p670_p7 }
 0x196   : > { %442 = dma.done.wait (!%p322_p2), %s244_s5, 128  }
 0x197   : > { %444 = vsyncadd (!%p322_p2), %s244_s5, 4294967168  ;;  %p18_p4 = scmp.ge.s32.totalorder %s514_s20, 4   ;;  %s672_s16 = smov %s451_s17 }
 0x198   : > { %s673_s17 = smov %s455_s18  ;;  %s674_s18 = smov %s526_s23 }
 0x199   : > { %s675_s19 = smov %s514_s20  ;;  %20 = sbr.rel (!%p18_p4) target bundleno = 8 (0x8), region = 77 }
 0x1a0   :  { %249 = vsyncpa [#allocation5], 1 }
 0x1a1   :  { %251 = vsyncpa [#allocation5 + $0x1], 1 }
 0x1a2   :  { %252 = vsyncpa [#allocation6], 1 }
 0x1a3   :  { %254 = vsyncpa [#allocation6 + $0x1], 1 }

</bundles_post_ra>
